<compile_context>
chip_gen: v5e
topology: v5e:2x2
jax: 0.10.0
libtpu: 0.0.40
codegen_flags: <defaults>
</compile_context>

<pallas_src>
import functools

import jax
import jax.numpy as jnp
from jax.experimental import pallas as pl
from jax.experimental.pallas import tpu as pltpu


def _round_up(x, m):
    return ((x + m - 1) // m) * m


# ----------------------------------------------------------------------------
# Unified Conv1d (+ bias + LeakyReLU) Pallas kernel.
# ----------------------------------------------------------------------------
def _conv1d_block_kernel(x_ref, w_ref, b_ref, o_ref, *,
                         taps, L_out, batch, n_in, neg_slope):
    # x_ref: (S, B, L_ph, n_in*128)     bf16  polyphase input (one 128-block
    #                                          for block-diagonal layers, the
    #                                          full padded width for dense)
    # w_ref: (1, n_in, K, 128, 128)     bf16  weights for out-block j
    # b_ref: (1, 128)                   f32   bias for out-block j
    # o_ref: (B, L_out, 128)            bf16  output block j
    bias = b_ref[...]                                    # (1, 128) f32
    for b in range(batch):
        acc = jnp.broadcast_to(bias, (L_out, 128))       # f32 accumulator
        for k, (r, q) in enumerate(taps):
            xw = x_ref[r, b, q:q + L_out, :]             # (L_out, n_in*128)
            for i in range(n_in):
                acc = acc + jnp.dot(xw[:, i * 128:(i + 1) * 128],
                                    w_ref[0, i, k],
                                    preferred_element_type=jnp.float32)
        if neg_slope != 1.0:
            acc = jnp.where(acc >= 0.0, acc, neg_slope * acc)
        o_ref[b] = acc.astype(o_ref.dtype)


def _conv_pallas(x_ph, w_blocks, bias2, *, taps, L_out, blockdiag, neg_slope):
    """x_ph:     (S, B, L_ph, C_in_p) polyphase padded input (any float dtype).
       w_blocks: (n_j, n_i_eff, K, 128, 128) bf16; n_i_eff == C_in_p//128
                 (dense) or 1 (block-diagonal grouped conv).
       bias2:    (1, C_out_p) f32.
       Returns leaky_relu(conv + bias): (B, L_out, n_j*128) bf16."""
    S, B, L_ph, C_in_p = x_ph.shape
    n_j, n_i_eff, K, _, _ = w_blocks.shape
    assert len(taps) == K

    if blockdiag:
        assert n_i_eff == 1
        # Grouped conv: exact block-diagonal structure at 128-ch granularity,
        # so out-block j only reads in-block j.
        x_spec = pl.BlockSpec((S, B, L_ph, 128), lambda j: (0, 0, 0, j))
    else:
        assert n_i_eff == C_in_p // 128
        # Full (small) input; constant block index => stays resident over j.
        x_spec = pl.BlockSpec((S, B, L_ph, C_in_p), lambda j: (0, 0, 0, 0))

    kernel = functools.partial(_conv1d_block_kernel, taps=tuple(taps),
                               L_out=L_out, batch=B, n_in=n_i_eff,
                               neg_slope=neg_slope)

    return pl.pallas_call(
        kernel,
        out_shape=jax.ShapeDtypeStruct((B, L_out, n_j * 128), jnp.bfloat16),
        grid_spec=pltpu.PrefetchScalarGridSpec(
            num_scalar_prefetch=0,
            grid=(n_j,),                                  # out-channel blocks
            in_specs=[
                x_spec,
                pl.BlockSpec((1, n_i_eff, K, 128, 128),
                             lambda j: (j, 0, 0, 0, 0)),
                pl.BlockSpec((1, 128), lambda j: (0, j)),
            ],
            out_specs=pl.BlockSpec((B, L_out, 128), lambda j: (0, 0, j)),
        ),
        compiler_params=pltpu.CompilerParams(
            dimension_semantics=("parallel",),
            vmem_limit_bytes=32 * 1024 * 1024),
    )(x_ph.astype(jnp.bfloat16), w_blocks, bias2)


# ----------------------------------------------------------------------------
# Wrapper glue: polyphase layout, per-layer application.
# ----------------------------------------------------------------------------
def _polyphase(x_pad, stride):
    """x_ph[r, b, m, c] = x_pad[b, m*stride + r, c]  (no data duplication)."""
    B, L_pad, C = x_pad.shape
    L_ph = -(-L_pad // stride)
    if L_ph * stride != L_pad:
        x_pad = jnp.pad(x_pad, ((0, 0), (0, L_ph * stride - L_pad), (0, 0)))
    return x_pad.reshape(B, L_ph, stride, C).transpose(2, 0, 1, 3)


def _apply_layer(x_nwc, lyr):
    p = lyr['pad']
    mode = 'reflect' if lyr['pad_mode'] == 'reflect' else 'constant'
    xp = jnp.pad(x_nwc, ((0, 0), (p, p), (0, 0)), mode=mode)
    K, s = lyr['K'], lyr['stride']
    c_in, c_out = lyr['c_in'], lyr['c_out']
    B, L_pad, _ = xp.shape
    L_out = (L_pad - K) // s + 1

    if lyr['mode'] == 'im2col':
        # Fold the K taps (x C_in) into the 128-lane contraction axis.
        end = s * (L_out - 1) + 1
        cols = jnp.stack([xp[:, k:k + end:s, :] for k in range(K)], axis=2)
        cols = cols.reshape(B, L_out, K * c_in)
        cols = jnp.pad(cols, ((0, 0), (0, 0), (0, lyr['C_in_p'] - K * c_in)))
        x_ph = cols[None]                         # (1, B, L_out, 128)
        taps = ((0, 0),)
    else:
        if lyr['C_in_p'] != c_in:
            xp = jnp.pad(xp, ((0, 0), (0, 0), (0, lyr['C_in_p'] - c_in)))
        x_ph = _polyphase(xp, s)                  # (s, B, L_ph, C_in_p)
        taps = tuple((k % s, k // s) for k in range(K))

    y = _conv_pallas(x_ph, lyr['w_blocks'], lyr['bias2'],
                     taps=taps, L_out=L_out,
                     blockdiag=lyr['blockdiag'], neg_slope=lyr['neg_slope'])
    return y[:, :, :c_out]


# ----------------------------------------------------------------------------
# Parameter construction (deterministic, synthetic) + kernel-ready packing.
# ----------------------------------------------------------------------------
def _prepare_layer(w_kio, bias, *, stride, pad, pad_mode, neg_slope, groups):
    """w_kio: (K, C_in, C_out) effective dense weight (f32)."""
    K, c_in, c_out = w_kio.shape
    # bf16-quantized dense weight kept only for the pure-JAX reference check.
    w_ref = w_kio.astype(jnp.bfloat16).astype(jnp.float32)

    im2col = (c_in * K <= 128)                    # e.g. layer 0: C_in=1, K=15
    if im2col:
        w_eff = w_kio.reshape(1, K * c_in, c_out)  # fold taps into contraction
        K_eff, c_in_eff = 1, K * c_in
    else:
        w_eff, K_eff, c_in_eff = w_kio, K, c_in

    C_in_p = _round_up(c_in_eff, 128)
    C_out_p = _round_up(c_out, 128)
    wp = jnp.pad(w_eff, ((0, 0), (0, C_in_p - c_in_eff), (0, C_out_p - c_out)))
    n_i, n_j = C_in_p // 128, C_out_p // 128
    # (n_j, n_i, K, 128_in, 128_out)
    blocks = wp.reshape(K_eff, n_i, 128, n_j, 128).transpose(3, 1, 0, 2, 4)

    # Grouped conv whose groups align with 128-blocks => exactly block-diagonal.
    g_in = c_in // groups
    g_out = c_out // groups
    blockdiag = (not im2col and groups > 1 and c_in == c_out and g_in == g_out
                 and c_in % 128 == 0 and 128 % g_in == 0)
    if blockdiag:
        d = jnp.arange(n_j)
        blocks = blocks[d, d][:, None]            # (n_blk, 1, K, 128, 128)

    bias2 = jnp.pad(bias, (0, C_out_p - c_out)).reshape(1, C_out_p)
    bias2 = bias2.astype(jnp.float32)

    return dict(mode='im2col' if im2col else 'conv', blockdiag=blockdiag,
                w_blocks=blocks.astype(jnp.bfloat16), bias2=bias2,
                w_ref=w_ref, bias_f32=bias.astype(jnp.float32),
                K=K, stride=stride, pad=pad, pad_mode=pad_mode,
                neg_slope=neg_slope, c_in=c_in, c_out=c_out,
                C_in_p=C_in_p, C_out_p=C_out_p)


def _make_wnconv(key, c_in, c_out, k, stride, groups, pad, pad_mode, neg_slope):
    kv, kg, kb = jax.random.split(key, 3)
    cg_in = c_in // groups
    v = 0.1 * jax.random.normal(kv, (c_out, cg_in, k), dtype=jnp.float32)
    g = 0.5 + jax.random.uniform(kg, (c_out,), dtype=jnp.float32)
    b = 0.05 * jax.random.normal(kb, (c_out,), dtype=jnp.float32)
    # weight_norm: w = g * v / ||v||_F (norm over dims (1, 2), per out channel)
    norm = jnp.sqrt(jnp.sum(v * v, axis=(1, 2), keepdims=True))
    w = v / norm * g[:, None, None]               # (C_out, Cg_in, K)
    # Dense block-diagonal equivalent of the grouped weight (exact, init-only;
    # the runtime kernel keeps only the diagonal 128-blocks for grouped convs).
    cg_out = c_out // groups
    w_r = w.reshape(groups, cg_out, cg_in, k)
    dense = jnp.einsum('goik,gh->gohik', w_r, jnp.eye(groups, dtype=w.dtype))
    dense = dense.reshape(c_out, c_in, k)
    w_kio = jnp.transpose(dense, (2, 1, 0))       # (K, C_in, C_out)
    return _prepare_layer(w_kio, b, stride=stride, pad=pad, pad_mode=pad_mode,
                          neg_slope=neg_slope, groups=groups)


def init_nlayer_discriminator(key, ndf, n_layers, downsampling_factor):
    layers = []
    key, k0 = jax.random.split(key)
    # layer_0: ReflectionPad1d(7) + WNConv1d(1, ndf, 15) + LeakyReLU(0.2)
    layers.append(_make_wnconv(k0, 1, ndf, 15, 1, 1, 7, 'reflect', 0.2))
    nf = ndf
    stride = downsampling_factor
    nf_prev = nf
    for n in range(1, n_layers + 1):
        nf_prev = nf
        nf = min(nf * stride, 1024)
        key, kn = jax.random.split(key)
        layers.append(_make_wnconv(kn, nf_prev, nf, stride * 10 + 1, stride,
                                   nf_prev // 4, stride * 5, 'zero', 0.2))
    nf = min(nf * 2, 1024)
    key, kn1 = jax.random.split(key)
    layers.append(_make_wnconv(kn1, nf_prev, nf, 5, 1, 1, 2, 'zero', 0.2))
    key, kn2 = jax.random.split(key)
    layers.append(_make_wnconv(kn2, nf, 1, 3, 1, 1, 1, 'zero', 1.0))  # no act
    return layers


# ----------------------------------------------------------------------------
# Forward pass (returns list of per-layer outputs, like the PyTorch module).
# ----------------------------------------------------------------------------
def nlayer_discriminator_forward(x_ncw, layers):
    x = jnp.transpose(x_ncw, (0, 2, 1))           # NCW -> NWC
    results = []
    for lyr in layers:
        x = _apply_layer(x, lyr)                  # (B, L_out, C_out) bf16
        results.append(jnp.transpose(x, (0, 2, 1)))
    return results


# Pure-JAX reference mirroring the kernel numerics (bf16 operands, f32
# accumulation, bf16 layer outputs) so the self-check can be tight.
def _forward_ref(x_ncw, layers):
    x = jnp.transpose(x_ncw, (0, 2, 1)).astype(jnp.float32)
    results = []
    for lyr in layers:
        xq = x.astype(jnp.bfloat16).astype(jnp.float32)
        p = lyr['pad']
        mode = 'reflect' if lyr['pad_mode'] == 'reflect' else 'constant'
        xp = jnp.pad(xq, ((0, 0), (p, p), (0, 0)), mode=mode)
        K, s = lyr['K'], lyr['stride']
        L_out = (xp.shape[1] - K) // s + 1
        end = s * (L_out - 1) + 1
        xc = jnp.stack([xp[:, k:k + end:s, :] for k in range(K)], axis=0)
        y = jnp.einsum('kbtc,kco->bto', xc, lyr['w_ref'],
                       preferred_element_type=jnp.float32) + lyr['bias_f32']
        y = jnp.where(y >= 0, y, lyr['neg_slope'] * y)
        x = y.astype(jnp.bfloat16).astype(jnp.float32)
        results.append(jnp.transpose(x, (0, 2, 1)))
    return results


if __name__ == "__main__":
    key = jax.random.PRNGKey(0)
    pkey, xkey = jax.random.split(key)

    # Smallest config for which the module's channel bookkeeping is consistent
    # (the hardcoded min(..., 1024) cap must be reached before the last conv).
    ndf, n_layers, downsampling_factor = 1024, 1, 2
    layers = init_nlayer_discriminator(pkey, ndf, n_layers, downsampling_factor)

    B, T = 2, 64
    x = jax.random.normal(xkey, (B, 1, T), dtype=jnp.float32)   # NCW, like PyTorch

    outs = jax.block_until_ready(nlayer_discriminator_forward(x, layers))

    expected_shapes = [(B, 1024, 64), (B, 1024, 32), (B, 1024, 32), (B, 1, 32)]
    assert [tuple(o.shape) for o in outs] == expected_shapes, \
        [tuple(o.shape) for o in outs]

    refs = _forward_ref(x, layers)
    # Both paths use identical bf16 operands / bf16 layer outputs with f32
    # accumulation; residual differences come only from accumulation order and
    # rare 1-ulp bf16 rounding flips (~0.4% of an element), so 2e-2 on a
    # max-abs/max-abs metric is a comfortable but meaningful bound.
    for o, r in zip(outs, refs):
        o32 = o.astype(jnp.float32)
        assert bool(jnp.all(jnp.isfinite(o32)))
        err = float(jnp.max(jnp.abs(o32 - r)) / (jnp.max(jnp.abs(r)) + 1e-6))
        assert err < 2e-2, f"mismatch vs reference: rel err {err}"

    print("KERNEL_OK")
</pallas_src>

<mosaic_0001>
module attributes {stable_mosaic.version = 11 : i64} {
  func.func @_conv1d_block_kernel(%arg0: i32, %arg1: memref<1x2x64x128xbf16, #tpu.memory_space<vmem>>, %arg2: memref<1x1x1x128x128xbf16, #tpu.memory_space<vmem>>, %arg3: memref<1x128xf32, #tpu.memory_space<vmem>>, %arg4: memref<2x64x128xbf16, #tpu.memory_space<vmem>>) attributes {dimension_semantics = [#tpu.dimension_semantics<parallel>], iteration_bounds = array<i64: 8>, scalar_prefetch = 0 : i64, scratch_operands = 0 : i64, tpu.core_type = #tpu.core_type<tc>, window_params = [{pipeline_mode = #tpu.pipeline_mode<synchronous>, transform_indices = @transform_0, window_bounds = array<i64: 1, 2, 64, 128>}, {transform_indices = @transform_1, window_bounds = array<i64: 1, 1, 1, 128, 128>}, {transform_indices = @transform_2, window_bounds = array<i64: 1, 128>}, {transform_indices = @transform_3, window_bounds = array<i64: 2, 64, 128>}]} {
    %c0 = arith.constant 0 : index
    %c0_0 = arith.constant 0 : index
    %0 = vector.load %arg3[%c0, %c0_0] : memref<1x128xf32, #tpu.memory_space<vmem>>, vector<1x128xf32>
    %1 = vector.shape_cast %0 : vector<1x128xf32> to vector<1x128xf32>
    %2 = vector.broadcast %1 : vector<1x128xf32> to vector<64x128xf32>
    %c0_1 = arith.constant 0 : index
    %c0_2 = arith.constant 0 : index
    %c0_3 = arith.constant 0 : index
    %c0_4 = arith.constant 0 : index
    %3 = vector.load %arg1[%c0_1, %c0_2, %c0_3, %c0_4] : memref<1x2x64x128xbf16, #tpu.memory_space<vmem>>, vector<1x1x64x128xbf16>
    %4 = vector.shape_cast %3 : vector<1x1x64x128xbf16> to vector<64x128xbf16>
    %c0_5 = arith.constant 0 : index
    %c0_6 = arith.constant 0 : index
    %c0_7 = arith.constant 0 : index
    %c0_8 = arith.constant 0 : index
    %c0_9 = arith.constant 0 : index
    %5 = vector.load %arg2[%c0_5, %c0_6, %c0_7, %c0_8, %c0_9] : memref<1x1x1x128x128xbf16, #tpu.memory_space<vmem>>, vector<1x1x1x128x128xbf16>
    %6 = vector.shape_cast %5 : vector<1x1x1x128x128xbf16> to vector<128x128xbf16>
    %cst = arith.constant dense<0.000000e+00> : vector<64x128xf32>
    %7 = tpu.matmul %4, %6, %cst {dimension_numbers = #tpu.dot_dimension_numbers<[1], [0], [0], [1], [0, 0, 1, 1], [], []>} : vector<64x128xbf16>, vector<128x128xbf16>, vector<64x128xf32> -> vector<64x128xf32>
    %8 = arith.addf %2, %7 : vector<64x128xf32>
    %cst_10 = arith.constant 0.000000e+00 : f32
    %9 = vector.broadcast %cst_10 : f32 to vector<64x128xf32>
    %10 = arith.cmpf oge, %8, %9 : vector<64x128xf32>
    %cst_11 = arith.constant 2.000000e-01 : f32
    %11 = vector.broadcast %cst_11 : f32 to vector<64x128xf32>
    %12 = arith.mulf %11, %8 : vector<64x128xf32>
    %13 = arith.select %10, %8, %12 : vector<64x128xi1>, vector<64x128xf32>
    %14 = arith.truncf %13 : vector<64x128xf32> to vector<64x128xbf16>
    %c0_12 = arith.constant 0 : index
    %c0_13 = arith.constant 0 : index
    %c0_14 = arith.constant 0 : index
    %15 = vector.load %arg4[%c0_12, %c0_13, %c0_14] : memref<2x64x128xbf16, #tpu.memory_space<vmem>>, vector<1x64x128xbf16>
    %16 = vector.shape_cast %15 : vector<1x64x128xbf16> to vector<64x128xbf16>
    %17 = vector.shape_cast %14 : vector<64x128xbf16> to vector<1x64x128xbf16>
    tpu.vector_store %arg4[%c0_12, %c0_13, %c0_14], %17 {strides = array<i32>} : memref<2x64x128xbf16, #tpu.memory_space<vmem>>, vector<1x64x128xbf16>,
    %18 = vector.shape_cast %0 : vector<1x128xf32> to vector<1x128xf32>
    %19 = vector.broadcast %18 : vector<1x128xf32> to vector<64x128xf32>
    %c0_15 = arith.constant 0 : index
    %c1 = arith.constant 1 : index
    %c0_16 = arith.constant 0 : index
    %c0_17 = arith.constant 0 : index
    %20 = vector.load %arg1[%c0_15, %c1, %c0_16, %c0_17] : memref<1x2x64x128xbf16, #tpu.memory_space<vmem>>, vector<1x1x64x128xbf16>
    %21 = vector.shape_cast %20 : vector<1x1x64x128xbf16> to vector<64x128xbf16>
    %c0_18 = arith.constant 0 : index
    %c0_19 = arith.constant 0 : index
    %c0_20 = arith.constant 0 : index
    %c0_21 = arith.constant 0 : index
    %c0_22 = arith.constant 0 : index
    %22 = vector.load %arg2[%c0_18, %c0_19, %c0_20, %c0_21, %c0_22] : memref<1x1x1x128x128xbf16, #tpu.memory_space<vmem>>, vector<1x1x1x128x128xbf16>
    %23 = vector.shape_cast %22 : vector<1x1x1x128x128xbf16> to vector<128x128xbf16>
    %cst_23 = arith.constant dense<0.000000e+00> : vector<64x128xf32>
    %24 = tpu.matmul %21, %23, %cst_23 {dimension_numbers = #tpu.dot_dimension_numbers<[1], [0], [0], [1], [0, 0, 1, 1], [], []>} : vector<64x128xbf16>, vector<128x128xbf16>, vector<64x128xf32> -> vector<64x128xf32>
    %25 = arith.addf %19, %24 : vector<64x128xf32>
    %cst_24 = arith.constant 0.000000e+00 : f32
    %26 = vector.broadcast %cst_24 : f32 to vector<64x128xf32>
    %27 = arith.cmpf oge, %25, %26 : vector<64x128xf32>
    %cst_25 = arith.constant 2.000000e-01 : f32
    %28 = vector.broadcast %cst_25 : f32 to vector<64x128xf32>
    %29 = arith.mulf %28, %25 : vector<64x128xf32>
    %30 = arith.select %27, %25, %29 : vector<64x128xi1>, vector<64x128xf32>
    %31 = arith.truncf %30 : vector<64x128xf32> to vector<64x128xbf16>
    %c1_26 = arith.constant 1 : index
    %c0_27 = arith.constant 0 : index
    %c0_28 = arith.constant 0 : index
    %32 = vector.load %arg4[%c1_26, %c0_27, %c0_28] : memref<2x64x128xbf16, #tpu.memory_space<vmem>>, vector<1x64x128xbf16>
    %33 = vector.shape_cast %32 : vector<1x64x128xbf16> to vector<64x128xbf16>
    %34 = vector.shape_cast %31 : vector<64x128xbf16> to vector<1x64x128xbf16>
    tpu.vector_store %arg4[%c1_26, %c0_27, %c0_28], %34 {strides = array<i32>} : memref<2x64x128xbf16, #tpu.memory_space<vmem>>, vector<1x64x128xbf16>,
    return
  }
  func.func @transform_0(%arg0: i32) -> (i32, i32, i32, i32) {
    %c0_i32 = arith.constant 0 : i32
    %c0_i32_0 = arith.constant 0 : i32
    %c0_i32_1 = arith.constant 0 : i32
    %c0_i32_2 = arith.constant 0 : i32
    %c0_i32_3 = arith.constant 0 : i32
    return %c0_i32, %c0_i32_0, %c0_i32_1, %c0_i32_2 : i32, i32, i32, i32
  }
  func.func @transform_1(%arg0: i32) -> (i32, i32, i32, i32, i32) {
    %c0_i32 = arith.constant 0 : i32
    %c0_i32_0 = arith.constant 0 : i32
    %c0_i32_1 = arith.constant 0 : i32
    %c0_i32_2 = arith.constant 0 : i32
    %c0_i32_3 = arith.constant 0 : i32
    return %arg0, %c0_i32, %c0_i32_0, %c0_i32_1, %c0_i32_2 : i32, i32, i32, i32, i32
  }
  func.func @transform_2(%arg0: i32) -> (i32, i32) {
    %c0_i32 = arith.constant 0 : i32
    %c0_i32_0 = arith.constant 0 : i32
    return %c0_i32, %arg0 : i32, i32
  }
  func.func @transform_3(%arg0: i32) -> (i32, i32, i32) {
    %c0_i32 = arith.constant 0 : i32
    %c0_i32_0 = arith.constant 0 : i32
    %c0_i32_1 = arith.constant 0 : i32
    return %c0_i32, %c0_i32_0, %arg0 : i32, i32, i32
  }
}

</mosaic_0001>

<bundles_post_ra>
// kernel: tpu_custom_call.1
= control target key start
LH: loop header
LB: loop body
LE: loop exit
PB: predicated region body
PF: predicated region fallthrough
CT: control target
= control target key end

     0   :  { %8 = vsyncpa [#allocation3], 0  ;;  %s1395_s0 = inlined_call_operand.hbm [shape: bf16[1,2,64,128], index: 0, kind: input, shape index: {}]   ;;  %s1396_s1 = inlined_call_operand.hbm [shape: bf16[8,1,1,128,128], index: 1, kind: input, shape index: {}]   ;;  %s1397_s2 = inlined_call_operand.hbm [shape: f32[1,1024], index: 2, kind: input, shape index: {}]   ;;  %s1398_s3 = inlined_call_operand.hbm [shape: bf16[2,64,1024], index: 3, kind: output, shape index: {}]  }
   0x1   :  { %9 = vsyncpa [#allocation6], 0 }
   0x2   :  { %11 = vsyncpa [#allocation6 + $0x1], 0 }
   0x3   :  { %12 = vsyncpa [#allocation4], 0 }
   0x4   :  { %14 = vsyncpa [#allocation4 + $0x1], 0  ;;  %s1171_s12 = smov 0   ;;  %s1173_s13 = smov 0  }
   0x5   :  { %s1175_s14 = smov 0   ;;  %s1177_s15 = smov 0  }
   0x6 LB: > { %s1192_s16 = sadd.s32 1, %s1143_s15   ;;  %s48_s17 = sadd.s32 1, %s1139_s14  ;;  %s1143_s15 = sphi %s1177_s15, %s1410_s15   ;;  %s1139_s14 = sphi %s1175_s14, %s1409_s14   ;;  %s1135_s13 = sphi %s1173_s13, %s1408_s13   ;;  %s1131_s12 = sphi %s1171_s12, %s1407_s12  }
   0x7   : > { %s45_s18 = ssub.s32 %s1143_s15, %s1192_s16  ;;  %p55_p0 = scmp.ne.s32.totalorder %s1139_s14, %s1135_s13 }
   0x8   : > { %p46_p1 = scmp.eq.s32.totalorder %s45_s18, 0  ;;  %p56_p2 = scmp.eq.s32.totalorder %s1143_s15, 0 }
   0x9   : > { %p941_p4 = scmp.lt.s32.totalorder %s1143_s15, 8  ;;  %s151_s20 = sand.u32 1, %s1143_s15  }
   0xa   : > { %s1201_s19 = scalar_select %p46_p1, %s1139_s14, %s48_s17  }
   0xb   : > { %p57_p3 = por %p56_p2, %p55_p0  ;;  %s153_s21 = sand.u32 1, %s1139_s14  }
   0xc   : > { %s712_s22 = sshll.u32 %s153_s21, 6  ;;  %s827_s23 = sshll.u32 %s1143_s15, 6 }
   0xd   : > { %s160_s26 = scalar_lea.hbm %s1396_s1, %s827_s23  ;;  %s155_s28 = scalar_lea.vmem [#allocation5], %s712_s22 }
   0xe   : > { %s161_s27 = sshll.u32 %s160_s26, 4  ;;  %s163_s29 = sshll.u32 %s155_s28, 4  ;;  %s162_s27 = int_to_ptr.hbm [resolvable:$true] %s161_s27  ;;  %s164_s29 = int_to_ptr.vmem [resolvable:$true] %s163_s29 }
   0xf   : > { %p1215_p5 = pnand %p941_p4, %p57_p3  ;;  %s1220_s4 = sadd.s32 4294967295, %s1143_s15  }
  0x10   : > { %s708_s5 = sadd.s32 4294967294, %s1143_s15   ;;  %s1223_s6 = scalar_lea.sflag [#allocation6], %s151_s20 }
  0x11   : > { %s983_s7 = sshra.s32 %s162_s27, 4  ;;  %p987_p7 = pneg %p1215_p5  ;;  %s984_s7 = int_to_ptr.hbm [resolvable:$true] %s983_s7 }
  0x12   : > { %s985_s8 = scalar_lea.hbm %s984_s7, 64  ;;  %s990_s11 = scalar_lea.hbm %s1396_s1, 512 }
  0x13   : > { %p986_p6 = scmp.ne.s32.totalorder %s984_s7, %s985_s8  ;;  %p991_p10 = scmp.lt.s32.totalorder %s984_s7, %s1396_s1 }
  0x14   : > { %p992_p11 = scmp.lt.s32.totalorder %s990_s11, %s985_s8 }
  0x15   : > { %p988_p8 = pnand %p987_p7, %p986_p6 }
  0x16   : > { %p993_p12 = por %p992_p11, %p991_p10 }
  0x17   : > { %p989_p9 = pneg %p988_p8 }
  0x19   : > { %p994_p13 = pnand %p993_p12, %p989_p9 }
  0x1b   : > { %997 = shalt.err (!%p994_p13)
}
  0x1c   : > { %s1145_s20 = smov 64   ;;  %s1146_s22 = smov 4  }
  0x1d   : > { %932 = dma.hbm_to_vmem [thread:$0]  (!%p1215_p5), %s162_s27, 1024, %s164_s29, %s1223_s6, %s1145_s20, %s1145_s20, %s1146_s22  }
  0x1e   : > { %p61_p1 = scmp.ne.s32.totalorder %s1135_s13, %s1131_s12  ;;  %p1399_p2 = scmp.eq.s32.totalorder %s1220_s4, 0 }
  0x1f   : > { %p111_p3 = scmp.eq.s32.totalorder %s1220_s4, 7  ;;  %p117_p4 = scmp.eq.s32.totalorder %s708_s5, 7 }
  0x20   : > { %p1245_p6 = por %p1399_p2, %p61_p1  ;;  %p709_p8 = scmp.ge.s32.totalorder %s1143_s15, 1 }
  0x21   : > { %p1253_p9 = por %p111_p3, %p55_p0  ;;  %p1257_p10 = por %p117_p4, %p61_p1 }
  0x22   : > { %p124_p11 = scmp.lt.s32.totalorder %s1143_s15, 9  ;;  %s135_s28 = sshll.u32 %s1395_s0, 4  ;;  %s136_s28 = int_to_ptr.hbm [resolvable:$true] %s135_s28 }
  0x23   : > { %s1147_s5 = smov [#allocation2]   ;;  %s179_s10 = scalar_lea.hbm %s1397_s2, %s1143_s15 }
  0x24   : > { %p1265_p12 = pnand %p709_p8, %p124_p11  ;;  %s137_s7 = sshll.u32 %s1147_s5, 4  ;;  %s138_s7 = int_to_ptr.vmem [resolvable:$true] %s137_s7 }
  0x25   : > { %s176_s11 = scalar_lea.vmem [#allocation7], %s153_s21  ;;  %s181_s18 = sshll.u32 %s179_s10, 4  ;;  %s182_s18 = int_to_ptr.hbm [resolvable:$true] %s181_s18 }
  0x26   : > { %p925_p0 = pneg %p1265_p12  ;;  %s183_s17 = sshll.u32 %s176_s11, 4  ;;  %s184_s17 = int_to_ptr.vmem [resolvable:$true] %s183_s17 }
  0x27   : > { %s1043_s26 = sshra.s32 %s182_s18, 4  ;;  %s1050_s9 = scalar_lea.hbm %s1397_s2, 8  ;;  %s1044_s26 = int_to_ptr.hbm [resolvable:$true] %s1043_s26 }
  0x28   : > { %p926_p13 = pnand %p925_p0, %p1399_p2  ;;  %s1045_s27 = scalar_lea.hbm %s1044_s26, 1 }
  0x29   : > { %p1046_p1 = scmp.ne.s32.totalorder %s1044_s26, %s1045_s27  ;;  %p1051_p8 = scmp.lt.s32.totalorder %s1044_s26, %s1397_s2 }
  0x2a   : > { %928 = dma.hbm_to_vmem [thread:$0]  (!%p926_p13), %s136_s28, 1024, %s138_s7, [#allocation3], %s1145_s20, %s1145_s20, %s1146_s22  }
  0x2b   : > { %p1048_p3 = pnand %p1046_p1, %p987_p7  ;;  %p1052_p11 = scmp.lt.s32.totalorder %s1050_s9, %s1045_s27 }
  0x2d   : > { %p1049_p4 = pneg %p1048_p3  ;;  %p1053_p0 = por %p1052_p11, %p1051_p8 }
  0x2f   : > { %p1054_p2 = pnand %p1053_p0, %p1049_p4 }
  0x31   : > { %1057 = shalt.err (!%p1054_p2)
}
  0x32   : > { %935 = dma.hbm_to_vmem [thread:$0]  (!%p1215_p5), %s182_s18, 16, %s184_s17, %s1223_s6  }
  0x33   : > { %192 = sbr.rel (%p1265_p12) target bundleno = 262 (0x106), region = 32  ;;  %p1405_p7 = scmp.eq.s32.totalorder (!%p1265_p12), %s1220_s4, 0 }
  0x38   : > { %1118 = dma.done.wait (%p1405_p7), [#allocation3], 1024   ;;  %p1406_p13 = pmov %p1405_p7 }
  0x39   : > { %s199_s20 = sand.u32 1, %s1220_s4   ;;  %s1299_s22 = sand.u32 1, %s1135_s13  }
  0x3a   : > { %1120 = vsyncadd (%p1406_p13), [#allocation3], 4294966272  ;;  %s717_s30 = sshll.u32 %s1299_s22, 6  ;;  %s200_s28 = scalar_lea.sflag [#allocation6], %s199_s20 }
  0x3b   : > { %s1304_s6 = scalar_lea.vmem [#allocation5], %s717_s30 }
  0x3c   : > { %1122 = dma.done.wait (%p1245_p6), %s200_s28, 1040  }
  0x3d   : > { %1124 = vsyncadd (%p1245_p6), %s200_s28, 4294966256  ;;  %v839_v0 = vld [vmem:[%s1304_s6 + $0x38] sm:$0xff]  ;;  %v838_v2 = vld [vmem:[%s1304_s6 + $0x30] sm:$0xff]  ;;  %s212_s23 = scalar_lea.vmem [#allocation7], %s1299_s22  ;;  %s1340_s29 = scalar_lea.vmem [#allocation8], %s717_s30 }
  0x3e   : > { %v851_v1 = vld [vmem:[%s1304_s6 + $0x38] sm:$0xff]  ;;  %340 = vmatpush.bf16.msra.mxu0 %v839_v0  ;;  %899 = vmatpush.bf16.msra.mxu2 %v839_v0  ;;  %v850_v3 = vld [vmem:[%s1304_s6 + $0x30] sm:$0xff]  ;;  %v837_v4 = vld [vmem:[%s1304_s6 + $0x28] sm:$0xff]  ;;  %s824_s7 = sshll.u32 %s1220_s4, 2  ;;  %s604_s4 = sshll.u32 %s1340_s29, 4  ;;  %s1362_s4 = int_to_ptr.vmem [resolvable:$true] %s604_s4 }
  0x3f   : > { %514 = vmatpush.bf16.msra.mxu1 %v851_v1  ;;  %907 = vmatpush.bf16.msra.mxu3 %v851_v1  ;;  %v849_v5 = vld [vmem:[%s1304_s6 + $0x28] sm:$0xff]  ;;  %v836_v6 = vld [vmem:[%s1304_s6 + $0x20] sm:$0xff]  ;;  %v835_v8 = vld [vmem:[%s1304_s6 + $0x18] sm:$0xff]  ;;  %s603_s18 = scalar_lea.hbm %s1398_s3, %s824_s7  ;;  %s593_s27 = scalar_lea.sflag [#allocation4], %s1299_s22 }
  0x40   : > { %v848_v7 = vld [vmem:[%s1304_s6 + $0x20] sm:$0xff]  ;;  %v847_v9 = vld [vmem:[%s1304_s6 + $0x18] sm:$0xff]  ;;  %v834_v10 = vld [vmem:[%s1304_s6 + $0x10] sm:$0xff]  ;;  %s606_s26 = sshll.u32 %s603_s18, 4  ;;  %s1093_s11 = scalar_lea.hbm %s1398_s3, 512  ;;  %s607_s26 = int_to_ptr.hbm [resolvable:$true] %s606_s26 }
  0x41   : > { %v846_v11 = vld [vmem:[%s1304_s6 + $0x10] sm:$0xff]  ;;  %v833_v12 = vld [vmem:[%s1304_s6 + $0x8] sm:$0xff]  ;;  %v832_v14 = vld [vmem:[%s1304_s6] sm:$0xff]  ;;  %s1087_s5 = sshra.s32 %s607_s26, 4  ;;  %s1088_s5 = int_to_ptr.hbm [resolvable:$true] %s1087_s5 }
  0x42   : > { %341 = vmatpush.bf16.msra.mxu0 %v838_v2  ;;  %900 = vmatpush.bf16.msra.mxu2 %v838_v2  ;;  %v845_v13 = vld [vmem:[%s1304_s6 + $0x8] sm:$0xff]  ;;  %v844_v15 = vld [vmem:[%s1304_s6] sm:$0xff]  ;;  %v830_v17 = vld [vmem:[#allocation2 + $0x10] sm:$0xff]  ;;  %s1089_s8 = scalar_lea.hbm %s1088_s5, 64  ;;  %p1094_p12 = scmp.lt.s32.totalorder %s1088_s5, %s1398_s3 }
  0x43   : > { %515 = vmatpush.bf16.msra.mxu1 %v850_v3  ;;  %908 = vmatpush.bf16.msra.mxu3 %v850_v3  ;;  %v828_v16 = vld [vmem:[#allocation2] sm:$0xff]  ;;  %v842_v19 = vld [vmem:[#allocation2 + $0x30] sm:$0xff]  ;;  %v829_v20 = vld [vmem:[#allocation2 + $0x8] sm:$0xff]  ;;  %p1090_p5 = scmp.ne.s32.totalorder %s1088_s5, %s1089_s8  ;;  %p1095_p1 = scmp.lt.s32.totalorder %s1093_s11, %s1089_s8 }
  0x44   : > { %v840_v18 = vld [vmem:[#allocation2 + $0x20] sm:$0xff]  ;;  %v831_v21 = vld [vmem:[#allocation2 + $0x18] sm:$0xff]  ;;  %v841_v22 = vld [vmem:[#allocation2 + $0x28] sm:$0xff] }
  0x45   : > { %v843_v23 = vld [vmem:[#allocation2 + $0x38] sm:$0xff]  ;;  %v1329_v25 = vld [vmem:[%s212_s23] ss:$0 sm:$0xff]  ;;  %p1091_p2 = pnand %p1090_p5, %p1253_p9  ;;  %p1096_p3 = por %p1095_p1, %p1094_p12 }
  0x46   : > { %342 = vmatpush.bf16.msra.mxu0 %v837_v4  ;;  %901 = vmatpush.bf16.msra.mxu2 %v837_v4 }
  0x47   : > { %516 = vmatpush.bf16.msra.mxu1 %v849_v5  ;;  %909 = vmatpush.bf16.msra.mxu3 %v849_v5  ;;  %p1092_p6 = pneg %p1091_p2 }
  0x49   : > { %p1097_p4 = pnand %p1096_p3, %p1092_p6 }
  0x4a   : > { %343 = vmatpush.bf16.msra.mxu0 %v836_v6  ;;  %902 = vmatpush.bf16.msra.mxu2 %v836_v6 }
  0x4b   : > { %517 = vmatpush.bf16.msra.mxu1 %v848_v7  ;;  %910 = vmatpush.bf16.msra.mxu3 %v848_v7 }
  0x4e   : > { %344 = vmatpush.bf16.msra.mxu0 %v835_v8  ;;  %903 = vmatpush.bf16.msra.mxu2 %v835_v8 }
  0x4f   : > { %518 = vmatpush.bf16.msra.mxu1 %v847_v9  ;;  %911 = vmatpush.bf16.msra.mxu3 %v847_v9 }
  0x52   : > { %345 = vmatpush.bf16.msra.mxu0 %v834_v10  ;;  %904 = vmatpush.bf16.msra.mxu2 %v834_v10 }
  0x53   : > { %519 = vmatpush.bf16.msra.mxu1 %v846_v11  ;;  %912 = vmatpush.bf16.msra.mxu3 %v846_v11 }
  0x56   : > { %346 = vmatpush.bf16.msra.mxu0 %v833_v12  ;;  %905 = vmatpush.bf16.msra.mxu2 %v833_v12 }
  0x57   : > { %520 = vmatpush.bf16.msra.mxu1 %v845_v13  ;;  %913 = vmatpush.bf16.msra.mxu3 %v845_v13 }
  0x5a   : > { %347 = vmatpush.bf16.msra.mxu0 %v832_v14  ;;  %906 = vmatpush.bf16.msra.mxu2 %v832_v14 }
  0x5b   : > { %521 = vmatpush.bf16.msra.mxu1 %v844_v15  ;;  %914 = vmatpush.bf16.msra.mxu3 %v844_v15 }
  0x5d   : > { %348 = vmatmul.bf16.vlgmr.msra.gmra.mxu0 %v828_v16  ;;  %358 = vmatmul.bf16.vlgmr.msra.gmra.mxu2 %v830_v17 }
  0x5e   : > { %522 = vmatmul.bf16.vlgmr.msra.gmra.mxu1 %v840_v18  ;;  %532 = vmatmul.bf16.vlgmr.msra.gmra.mxu3 %v842_v19 }
  0x6d   : > { %353 = vmatmul.bf16.gmra.mxu0 %v829_v20  ;;  %363 = vmatmul.bf16.gmra.mxu2 %v831_v21 }
  0x6e   : > { %527 = vmatmul.bf16.gmra.mxu1 %v841_v22  ;;  %537 = vmatmul.bf16.gmra.mxu3 %v843_v23 }
  0xda   : > { %v349_v24 = vpop.f32.mrf.mxu0 }
  0xdb   : > { %v523_v26 = vpop.f32.mrf.mxu1  ;;  %v369_v27 = vadd.f32 %v1329_v25, %v349_v24 }
  0xdc   : > { %v543_v28 = vadd.f32 %v1329_v25, %v523_v26 }
  0xdd   : > { %v385_v32 = vmul.f32 0.2, %v369_v27  ;;  %vm377_vm0 = vcmp.ge.f32.partialorder %v369_v27, 0.0 }
  0xde   : > { %v559_v35 = vmul.f32 0.2, %v543_v28  ;;  %vm551_vm1 = vcmp.ge.f32.partialorder %v543_v28, 0.0 }
  0xdf   : > { %v393_v41 = vsel %vm377_vm0, %v369_v27, %v385_v32 }
  0xe0   : > { %v359_v29 = vpop.f32.mrf.mxu2  ;;  %v567_v43 = vsel %vm551_vm1, %v543_v28, %v559_v35 }
  0xe1   : > { %v533_v30 = vpop.f32.mrf.mxu3  ;;  %v373_v37 = vadd.f32 %v1329_v25, %v359_v29 }
  0xe2   : > { %v351_v31 = vpop.f32.mrf.mxu0  ;;  %v547_v39 = vadd.f32 %v1329_v25, %v533_v30 }
  0xe3   : > { %v370_v33 = vadd.f32 %v1329_v25, %v351_v31  ;;  %v525_v34 = vpop.f32.mrf.mxu1  ;;  %v389_v47 = vmul.f32 0.2, %v373_v37  ;;  %vm381_vm4 = vcmp.ge.f32.partialorder %v373_v37, 0.0 }
  0xe4   : > { %v544_v36 = vadd.f32 %v1329_v25, %v525_v34  ;;  %v563_v51 = vmul.f32 0.2, %v547_v39  ;;  %vm555_vm5 = vcmp.ge.f32.partialorder %v547_v39, 0.0 }
  0xe5   : > { %vm378_vm2 = vcmp.ge.f32.partialorder %v370_v33, 0.0  ;;  %v386_v38 = vmul.f32 0.2, %v370_v33  ;;  %v397_v57 = vsel %vm381_vm4, %v373_v37, %v389_v47 }
  0xe6   : > { %vm552_vm3 = vcmp.ge.f32.partialorder %v544_v36, 0.0  ;;  %v560_v40 = vmul.f32 0.2, %v544_v36  ;;  %v571_v59 = vsel %vm555_vm5, %v547_v39, %v563_v51 }
  0xe7   : > { %v394_v42 = vsel %vm378_vm2, %v370_v33, %v386_v38 }
  0xe8   : > { %v855_v44 = vpack.c.bf16 %v394_v42, %v393_v41  ;;  %v568_v45 = vsel %vm552_vm3, %v544_v36, %v560_v40  ;;  %v361_v46 = vpop.f32.mrf.mxu2 }
  0xe9   : > { %v875_v48 = vpack.c.bf16 %v568_v45, %v567_v43  ;;  %v374_v49 = vadd.f32 %v1329_v25, %v361_v46  ;;  %v535_v50 = vpop.f32.mrf.mxu3 }
  0xea   : > { %856 = vst [vmem:[%s1340_s29] sm:$0xff] %v855_v44   ;;  %v548_v52 = vadd.f32 %v1329_v25, %v535_v50  ;;  %v354_v53 = vpop.f32.mrf.mxu0 }
  0xeb   : > { %895 = vst [vmem:[%s1340_s29 + $0x20] sm:$0xff] %v875_v48   ;;  %vm382_vm6 = vcmp.ge.f32.partialorder %v374_v49, 0.0  ;;  %v390_v54 = vmul.f32 0.2, %v374_v49  ;;  %v528_v55 = vpop.f32.mrf.mxu1  ;;  %v371_v63 = vadd.f32 %v1329_v25, %v354_v53 }
  0xec   : > { %vm556_vm7 = vcmp.ge.f32.partialorder %v548_v52, 0.0  ;;  %v564_v56 = vmul.f32 0.2, %v548_v52  ;;  %v545_v0 = vadd.f32 %v1329_v25, %v528_v55 }
  0xed   : > { %v398_v58 = vsel %vm382_vm6, %v374_v49, %v390_v54  ;;  %v387_v4 = vmul.f32 0.2, %v371_v63  ;;  %vm379_vm8 = vcmp.ge.f32.partialorder %v371_v63, 0.0 }
  0xee   : > { %v865_v60 = vpack.c.bf16 %v398_v58, %v397_v57  ;;  %v572_v61 = vsel %vm556_vm7, %v548_v52, %v564_v56  ;;  %v561_v7 = vmul.f32 0.2, %v545_v0  ;;  %vm553_vm9 = vcmp.ge.f32.partialorder %v545_v0, 0.0 }
  0xef   : > { %v885_v62 = vpack.c.bf16 %v572_v61, %v571_v59  ;;  %v395_v13 = vsel %vm379_vm8, %v371_v63, %v387_v4 }
  0xf0   : > { %893 = vst [vmem:[%s1340_s29 + $0x10] sm:$0xff] %v865_v60   ;;  %v364_v1 = vpop.f32.mrf.mxu2  ;;  %v569_v15 = vsel %vm553_vm9, %v545_v0, %v561_v7 }
  0xf1   : > { %897 = vst [vmem:[%s1340_s29 + $0x30] sm:$0xff] %v885_v62   ;;  %v538_v2 = vpop.f32.mrf.mxu3  ;;  %v375_v9 = vadd.f32 %v1329_v25, %v364_v1 }
  0xf2   : > { %v356_v3 = vpop.f32.mrf.mxu0  ;;  %v549_v11 = vadd.f32 %v1329_v25, %v538_v2 }
  0xf3   : > { %v372_v5 = vadd.f32 %v1329_v25, %v356_v3  ;;  %v530_v6 = vpop.f32.mrf.mxu1  ;;  %v391_v19 = vmul.f32 0.2, %v375_v9  ;;  %vm383_vm12 = vcmp.ge.f32.partialorder %v375_v9, 0.0 }
  0xf4   : > { %v546_v8 = vadd.f32 %v1329_v25, %v530_v6  ;;  %v565_v23 = vmul.f32 0.2, %v549_v11  ;;  %vm557_vm13 = vcmp.ge.f32.partialorder %v549_v11, 0.0 }
  0xf5   : > { %vm380_vm10 = vcmp.ge.f32.partialorder %v372_v5, 0.0  ;;  %v388_v10 = vmul.f32 0.2, %v372_v5  ;;  %v399_v28 = vsel %vm383_vm12, %v375_v9, %v391_v19 }
  0xf6   : > { %vm554_vm11 = vcmp.ge.f32.partialorder %v546_v8, 0.0  ;;  %v562_v12 = vmul.f32 0.2, %v546_v8  ;;  %v573_v30 = vsel %vm557_vm13, %v549_v11, %v565_v23 }
  0xf7   : > { %v396_v14 = vsel %vm380_vm10, %v372_v5, %v388_v10 }
  0xf8   : > { %v860_v16 = vpack.c.bf16 %v396_v14, %v395_v13  ;;  %v570_v17 = vsel %vm554_vm11, %v546_v8, %v562_v12  ;;  %v366_v18 = vpop.f32.mrf.mxu2 }
  0xf9   : > { %v880_v20 = vpack.c.bf16 %v570_v17, %v569_v15  ;;  %v376_v21 = vadd.f32 %v1329_v25, %v366_v18  ;;  %v540_v22 = vpop.f32.mrf.mxu3 }
  0xfa   : > { %892 = vst [vmem:[%s1340_s29 + $0x8] sm:$0xff] %v860_v16   ;;  %v550_v24 = vadd.f32 %v1329_v25, %v540_v22 }
  0xfb   : > { %896 = vst [vmem:[%s1340_s29 + $0x28] sm:$0xff] %v880_v20   ;;  %vm384_vm14 = vcmp.ge.f32.partialorder %v376_v21, 0.0  ;;  %v392_v26 = vmul.f32 0.2, %v376_v21 }
  0xfc   : > { %vm558_vm15 = vcmp.ge.f32.partialorder %v550_v24, 0.0  ;;  %v566_v27 = vmul.f32 0.2, %v550_v24 }
  0xfd   : > { %v400_v29 = vsel %vm384_vm14, %v376_v21, %v392_v26 }
  0xfe   : > { %v870_v31 = vpack.c.bf16 %v400_v29, %v399_v28  ;;  %v574_v32 = vsel %vm558_vm15, %v550_v24, %v566_v27 }
  0xff   : > { %v890_v25 = vpack.c.bf16 %v574_v32, %v573_v30 }
 0x100   : > { %894 = vst [vmem:[%s1340_s29 + $0x18] sm:$0xff] %v870_v31  }
 0x101   : > { %898 = vst [vmem:[%s1340_s29 + $0x38] sm:$0xff] %v890_v25  }
 0x102   : > { %1100 = shalt.err (!%p1097_p4)
}
 0x103   : > { %s1148_s22 = smov 64   ;;  %s1149_s28 = smov 512  }
 0x104   : > { %s1150_s6 = smov 4  }
 0x105   : > { %923 = dma.vmem_to_hbm [thread:$0]  (%p1253_p9), %s1362_s4, 1024, %s607_s26, %s593_s27, %s1148_s22, %s1149_s28, %s1150_s6  }
 0x106 PF: > { %p943_p8 = scmp.ge.s32.totalorder %s1143_s15, 2  ;;  %s621_s23 = sand.u32 1, %s1131_s12  }
 0x107   : > { %s622_s29 = scalar_lea.sflag [#allocation4], %s621_s23 }
 0x108   : > { %p937_p11 = pnand %p943_p8, %p1257_p10 }
 0x10a   : > { %p938_p0 = pneg %p937_p11 }
 0x10c   : > { %1126 = dma.done.wait (%p938_p0), %s622_s29, 1024  }
 0x10d   : > { %1128 = vsyncadd (%p938_p0), %s622_s29, 4294966272  ;;  %p17_p7 = scmp.ge.s32.totalorder %s1192_s16, 10   ;;  %s1407_s12 = smov %s1135_s13 }
 0x10e   : > { %s1408_s13 = smov %s1139_s14  ;;  %s1409_s14 = smov %s1201_s19 }
 0x10f   : > { %s1410_s15 = smov %s1192_s16  ;;  %19 = sbr.rel (!%p17_p7) target bundleno = 6 (0x6), region = 95 }
 0x114   :  { %628 = vsyncpa [#allocation3], 1 }
 0x115   :  { %630 = vsyncpa [#allocation3 + $0x1], 1 }
 0x116   :  { %631 = vsyncpa [#allocation6], 1 }
 0x117   :  { %633 = vsyncpa [#allocation6 + $0x1], 1 }
 0x118   :  { %634 = vsyncpa [#allocation4], 1 }
 0x119   :  { %636 = vsyncpa [#allocation4 + $0x1], 1 }

</bundles_post_ra>
